<compile_context>
chip_gen: v6e
topology: v6e:2x2x1
jax: 0.10.0
libtpu: 0.0.40
codegen_flags: <defaults>
</compile_context>

<pallas_src>
from functools import partial

import numpy as np
import jax
import jax.numpy as jnp
from jax.experimental import pallas as pl
from jax.experimental.pallas import tpu as pltpu

CLS_ID = 101     # bert-base-uncased [CLS]
SEP_ID = 102     # bert-base-uncased [SEP]
PAD_ID = 0       # bert-base-uncased [PAD]
MAX_LENGTH = 77
LANE = 128       # lane-dense working width (>= MAX_LENGTH, multiple of 128)


def _pack_kernel(slab_ref, out_ref, *, limit):
    """Pack token ids into [CLS] toks [SEP] [PAD]... layout.

    slab_ref: [tb, 128] int16/int32. Lane 0 holds the raw sequence length,
              lane p (p >= 1) holds raw wordpiece token p-1.
    out_ref:  [tb, 128] int32 packed ids (lanes >= MAX_LENGTH are PAD).
    limit:    static truncation bound = min(LANE - 1, max_length - 2).
    """
    tb, T = out_ref.shape
    slab = slab_ref[...].astype(jnp.int32)                     # [tb, 128]
    pos = jax.lax.broadcasted_iota(jnp.int32, (tb, T), 1)      # [tb, 128]
    L = jnp.clip(slab[:, :1], 0, limit)                        # [tb, 1]
    # pos in 1..L -> token, pos == L+1 -> SEP, else PAD; force CLS at pos 0
    # (pos 0 would otherwise read the length stored in lane 0).
    out = jnp.where(pos <= L, slab,
                    jnp.where(pos == L + 1, SEP_ID, PAD_ID))
    out = jnp.where(pos == 0, CLS_ID, out)
    out_ref[...] = out.astype(out_ref.dtype)


def _round_up(x, m):
    return ((x + m - 1) // m) * m


def _choose_block_rows(B, block_b, split_threshold=2048):
    """Row-block size: full batch when small, >= 2 grid steps when large
    (so dimension_semantics=('parallel',) shards across v7x's two TCs),
    capped at block_b rows (multiple of 16 for int16 sublane packing)."""
    block_b = max(16, _round_up(block_b, 16))
    if B <= split_threshold:
        tb = B
    else:
        tb = _round_up(pl.cdiv(B, 2), 16)
    tb = min(tb, block_b)
    return B if tb >= B else tb


def pack_host_inputs(raw_tokens, lengths, *, dtype=np.int16):
    """Host-side stand-in for the HF tokenizer's output buffer.

    Builds the [B, 128] slab the kernel consumes: lane 0 = length,
    lanes 1.. = raw wordpiece ids. (The real tokenizer writes a fixed-width
    host buffer anyway, so this costs no device HBM pass.)
    """
    raw = np.asarray(raw_tokens)
    lens = np.asarray(lengths)
    B, R = raw.shape
    slab = np.zeros((B, LANE), dtype=dtype)
    n = min(R, LANE - 1)
    slab[:, 1:1 + n] = raw[:, :n].astype(dtype)
    slab[:, 0] = np.clip(lens, 0, np.iinfo(dtype).max).astype(dtype)
    return jnp.asarray(slab)


def bert_tokenize_pack(packed, max_length=MAX_LENGTH, *, block_b=8192,
                       lane_dense=False):
    """packed: [B, 128] int16/int32 slab (lane 0 = length, lanes 1.. = ids).

    Returns int32 input_ids. With lane_dense=True returns the [B, 128] slab
    (lanes >= max_length are PAD) so downstream consumers can slice/fuse in
    their own jit; otherwise returns the sliced [B, max_length] tensor.
    """
    B, C = packed.shape
    assert C == LANE, f"producer must emit a {LANE}-lane slab, got {C}"
    limit = min(C - 1, max_length - 2)   # static content-length bound (75)

    tb = _choose_block_rows(B, block_b)
    grid = (pl.cdiv(B, tb),)             # partial last block handled by masking

    out = pl.pallas_call(
        partial(_pack_kernel, limit=limit),
        out_shape=jax.ShapeDtypeStruct((B, LANE), jnp.int32),
        grid=grid,
        in_specs=[pl.BlockSpec((tb, LANE), lambda i: (i, 0))],
        out_specs=pl.BlockSpec((tb, LANE), lambda i: (i, 0)),
        compiler_params=pltpu.CompilerParams(
            dimension_semantics=("parallel",),
            vmem_limit_bytes=32 * 1024 * 1024),
    )(packed)

    if lane_dense:
        return out
    # Semantic (PyTorch-shaped) output; costs one extra HBM pass over the
    # output. Prefer lane_dense=True and slicing inside the consumer's jit.
    return out[:, :max_length]


def _reference(raw_tokens, lengths, max_length=MAX_LENGTH):
    raw = np.asarray(raw_tokens)
    lens = np.asarray(lengths)
    B, R = raw.shape
    out = np.full((B, max_length), PAD_ID, dtype=np.int32)
    for b in range(B):
        L = max(0, min(int(lens[b]), R, max_length - 2))
        out[b, 0] = CLS_ID
        out[b, 1:1 + L] = raw[b, :L]
        out[b, 1 + L] = SEP_ID
    return out


if __name__ == "__main__":
    key = jax.random.PRNGKey(0)

    # --- primary check: batch of 2 "sentences", up to 96 raw wordpiece ids ---
    B, R = 2, 96
    k_tok, k_rest = jax.random.split(key)
    raw_tokens = jax.random.randint(k_tok, (B, R), minval=1000, maxval=30522,
                                    dtype=jnp.int32)
    lengths = jnp.array([50, 90], dtype=jnp.int32)   # one short, one truncated

    packed = pack_host_inputs(raw_tokens, lengths, dtype=np.int16)
    slab = bert_tokenize_pack(packed, lane_dense=True)      # optimized path
    slab = jax.block_until_ready(slab)

    expected = _reference(raw_tokens, lengths)
    slab_np = np.asarray(slab)
    assert slab.shape == (B, LANE), slab.shape
    np.testing.assert_array_equal(slab_np[:, :MAX_LENGTH], expected)
    assert np.all(slab_np[:, MAX_LENGTH:] == PAD_ID)

    # --- secondary check: multi-step grid + partial last block + sliced path ---
    B2 = 300
    k1, k2 = jax.random.split(k_rest)
    raw2 = jax.random.randint(k1, (B2, R), minval=1000, maxval=30522,
                              dtype=jnp.int32)
    lens2 = jax.random.randint(k2, (B2,), minval=0, maxval=R, dtype=jnp.int32)
    packed2 = pack_host_inputs(raw2, lens2, dtype=np.int16)
    out2 = jax.block_until_ready(bert_tokenize_pack(packed2, block_b=128))
    assert out2.shape == (B2, MAX_LENGTH), out2.shape
    np.testing.assert_array_equal(np.asarray(out2), _reference(raw2, lens2))

    print("KERNEL_OK")
</pallas_src>

<mosaic_0001>
module attributes {stable_mosaic.version = 11 : i64} {
  func.func @_pack_kernel(%arg0: i32, %arg1: memref<2x128xi16, #tpu.memory_space<vmem>>, %arg2: memref<2x128xi32, #tpu.memory_space<vmem>>) attributes {dimension_semantics = [#tpu.dimension_semantics<parallel>], iteration_bounds = array<i64: 1>, scalar_prefetch = 0 : i64, scratch_operands = 0 : i64, tpu.core_type = #tpu.core_type<tc>, window_params = [{transform_indices = @transform_0, window_bounds = array<i64: 2, 128>}, {transform_indices = @transform_1, window_bounds = array<i64: 2, 128>}]} {
    %c0 = arith.constant 0 : index
    %c0_0 = arith.constant 0 : index
    %0 = vector.load %arg1[%c0, %c0_0] : memref<2x128xi16, #tpu.memory_space<vmem>>, vector<2x128xi16>
    %1 = arith.extsi %0 : vector<2x128xi16> to vector<2x128xi32>
    %2 = tpu.iota {dimensions = array<i32: 1>} : vector<2x128xi32>
    %3 = vector.extract_strided_slice %1 {offsets = [0, 0], sizes = [2, 1], strides = [1, 1]} : vector<2x128xi32> to vector<2x1xi32>
    %c0_i32 = arith.constant 0 : i32
    %c75_i32 = arith.constant 75 : i32
    %4 = vector.broadcast %c0_i32 : i32 to vector<2x1xi32>
    %5 = arith.maxsi %4, %3 : vector<2x1xi32>
    %6 = vector.broadcast %c75_i32 : i32 to vector<2x1xi32>
    %7 = arith.minsi %6, %5 : vector<2x1xi32>
    %8 = vector.broadcast %7 : vector<2x1xi32> to vector<2x128xi32>
    %9 = arith.cmpi sle, %2, %8 : vector<2x128xi32>
    %c1_i32 = arith.constant 1 : i32
    %10 = vector.broadcast %c1_i32 : i32 to vector<2x1xi32>
    %11 = arith.addi %7, %10 : vector<2x1xi32>
    %12 = vector.broadcast %11 : vector<2x1xi32> to vector<2x128xi32>
    %13 = arith.cmpi eq, %2, %12 : vector<2x128xi32>
    %c102_i32 = arith.constant 102 : i32
    %c0_i32_1 = arith.constant 0 : i32
    %14 = vector.broadcast %c102_i32 : i32 to vector<2x128xi32>
    %15 = vector.broadcast %c0_i32_1 : i32 to vector<2x128xi32>
    %16 = arith.select %13, %14, %15 : vector<2x128xi1>, vector<2x128xi32>
    %17 = arith.select %9, %1, %16 : vector<2x128xi1>, vector<2x128xi32>
    %c0_i32_2 = arith.constant 0 : i32
    %18 = vector.broadcast %c0_i32_2 : i32 to vector<2x128xi32>
    %19 = arith.cmpi eq, %2, %18 : vector<2x128xi32>
    %c101_i32 = arith.constant 101 : i32
    %20 = vector.broadcast %c101_i32 : i32 to vector<2x128xi32>
    %21 = arith.select %19, %20, %17 : vector<2x128xi1>, vector<2x128xi32>
    %c0_3 = arith.constant 0 : index
    %c0_4 = arith.constant 0 : index
    %22 = vector.load %arg2[%c0_3, %c0_4] : memref<2x128xi32, #tpu.memory_space<vmem>>, vector<2x128xi32>
    tpu.vector_store %arg2[%c0_3, %c0_4], %21 {strides = array<i32>} : memref<2x128xi32, #tpu.memory_space<vmem>>, vector<2x128xi32>,
    return
  }
  func.func @transform_0(%arg0: i32) -> (i32, i32) {
    %c0_i32 = arith.constant 0 : i32
    %c0_i32_0 = arith.constant 0 : i32
    return %arg0, %c0_i32 : i32, i32
  }
  func.func @transform_1(%arg0: i32) -> (i32, i32) {
    %c0_i32 = arith.constant 0 : i32
    %c0_i32_0 = arith.constant 0 : i32
    return %arg0, %c0_i32 : i32, i32
  }
}

</mosaic_0001>

<bundles_post_ra>
// kernel: tpu_custom_call.1
= control target key start
LH: loop header
LB: loop body
LE: loop exit
PB: predicated region body
PF: predicated region fallthrough
CT: control target
= control target key end

     0   :  { %6 = vsyncpa [#allocation3], 0  ;;  %s141_s0 = inlined_call_operand.hbm [shape: s16[2,128], index: 0, kind: input, shape index: {}]   ;;  %s142_s1 = inlined_call_operand.hbm [shape: s32[2,128], index: 1, kind: output, shape index: {}]  }
   0x1   :  { %7 = vsyncpa [#allocation4], 0  ;;  %s121_s6 = smov [#allocation2]  }
   0x2   :  { %s14_s7 = sshll.u32 %s121_s6, 4  ;;  %s15_s7 = int_to_ptr.vmem [resolvable:$true] %s14_s7 }
   0x3   :  { %s85_s8 = scalar_lea.vmem %s15_s7, 16  ;;  %s89_s9 = scalar_lea.vmem %s15_s7, 32 }
   0x4   :  { %p86_p0 = scmp.ne.s32.totalorder %s15_s7, %s85_s8  ;;  %p90_p1 = scmp.lt.s32.totalorder %s15_s7, %s15_s7 }
   0x5   :  { %p91_p2 = scmp.lt.s32.totalorder %s89_s9, %s85_s8 }
   0x7   :  { %p92_p3 = por %p91_p2, %p90_p1 }
   0x9   :  { %p93_p4 = pnand %p92_p3, %p86_p0 }
   0xb   :  { %96 = shalt.err (!%p93_p4)
}
   0xc   :  { %17 = dma.hbm_to_vmem [thread:$0]  %s141_s0, 16, %s15_s7, [#allocation3]  }
   0xd   :  { %117 = dma.done.wait [#allocation3], 16  }
   0xe   :  { %118 = vsyncadd [#allocation3], 4294967280  ;;  %v122_v0 = vmov 0   ;;  %v21_v1 = vld [vmem:[#allocation2] sm:$0x1]  ;;  %v23_v6 = vlaneseq  ;;  %s124_s0 = smov [#allocation5]  }
   0xf   :  { %76 = vset.pattern.permute.xlu0 %v122_v0  ;;  %v22_v2 = vunpack.c.l.b16 %v21_v1  ;;  %v123_v7 = vmov 269488144   ;;  %s63_s12 = sshll.u32 %s124_s0, 4  ;;  %s64_s12 = int_to_ptr.vmem [resolvable:$true] %s63_s12 }
  0x10   :  { %v33_v8 = vunpack.c.l.s4 %v123_v7  ;;  %v36_v10 = vshrl.u32 %v23_v6, 7  ;;  %v24_v12 = vand.u32 127, %v23_v6  ;;  %s97_s13 = scalar_lea.vmem %s64_s12, 32  ;;  %p102_p6 = scmp.lt.s32.totalorder %s64_s12, %s64_s12 }
  0x11   :  { %vm25_vm0 = vcmp.gt.s32.totalorder %v22_v2, 0  ;;  %p98_p5 = scmp.ne.s32.totalorder %s64_s12, %s97_s13  ;;  %p103_p7 = scmp.lt.s32.totalorder %s97_s13, %s97_s13 }
  0x12   :  { %v26_v3 = vsel %vm25_vm0, %v22_v2, 0  ;;  %v34_v9 = vunpack.c.0.s8 %v33_v8  ;;  %vm54_vm3 = vcmp.eq.s32.totalorder %v24_v12, 0 }
  0x13   :  { %vm27_vm1 = vcmp.lt.s32.totalorder %v26_v3, 75  ;;  %p104_p8 = por %p103_p7, %p102_p6 }
  0x14   :  { %v28_v4 = vsel %vm27_vm1, %v26_v3, 75  ;;  %v37_v11 = vsub.s32 %v34_v9, %v36_v10 }
  0x15   :  { %v40_v5 = vadd.s32 1, %v28_v4  ;;  %p105_p9 = pnand %p104_p8, %p98_p5 }
  0x17   :  { %42 = vperm.xlu0 %76, %v40_v5  }
  0x1b   :  { %30 = vperm.xlu0 %76, %v28_v4  }
  0x92   :  { %v43_v13 = vpop.permute.xlu0 %42 }
  0x93   :  { %v50_v14 = vrot.slane %v43_v13, %v37_v11 }
  0x95   :  { %vm51_vm2 = vcmp.eq.s32.totalorder %v24_v12, %v50_v14 }
  0x96   :  { %v31_v15 = vpop.permute.xlu0 %30  ;;  %v52_v17 = vsel %vm51_vm2, 102, %v122_v0 }
  0x97   :  { %v38_v16 = vrot.slane %v31_v15, %v37_v11 }
  0x99   :  { %vm39_vm4 = vcmp.le.s32.totalorder %v24_v12, %v38_v16 }
  0x9a   :  { %v53_v18 = vsel %vm39_vm4, %v22_v2, %v52_v17 }
  0x9b   :  { %v55_v19 = vsel %vm54_vm3, 101, %v53_v18 }
  0x9c   :  { %56 = vst [vmem:[#allocation5] sm:$0x3] %v55_v19 }
  0x9d   :  { %108 = shalt.err (!%p105_p9)
}
  0x9e   :  { %66 = dma.vmem_to_hbm [thread:$0]  %s64_s12, 32, %s142_s1, [#allocation4]  }
  0x9f   :  { %119 = dma.done.wait [#allocation4], 32  }
  0xa0   :  { %120 = vsyncadd [#allocation4], 4294967264 }
  0xa1   :  { %70 = vsyncpa [#allocation3], 1 }
  0xa2   :  { %71 = vsyncpa [#allocation4], 1 }

</bundles_post_ra>
